<compile_context>
chip_gen: v7x
topology: tpu7x:2x2x1
jax: 0.10.0
libtpu: 0.0.40
codegen_flags: <defaults>
</compile_context>

<pallas_src>
import jax
import jax.numpy as jnp
from jax.experimental import pallas as pl
from jax.experimental.pallas import tpu as pltpu

_LANE = 128
_SUBLANE = 8
# Keep (in + out) double-buffered tiles comfortably under VMEM on all chips:
# 2 arrays * 2 buffers * tile_bytes <= ~8 MiB  =>  tile_bytes <= ~2 MiB.
_TARGET_TILE_BYTES = 2 * 1024 * 1024


def _copy_kernel(x_ref, o_ref):
    # Pure copy: identity forward pass.
    o_ref[...] = x_ref[...]


def _best_lane_width(n):
    """Largest lane-multiple width (>=128) that evenly divides the flat length."""
    for cols in (4096, 2048, 1024, 512, 256, 128):
        if n % cols == 0:
            return cols
    return None


def _lane_dense_copy(flat):
    """Tiled, double-buffered, lane-dense copy of a (rows, cols) view."""
    rows, cols = flat.shape
    itemsize = flat.dtype.itemsize
    # Rows per tile: ~2 MiB per buffer, rounded to a multiple of 8 sublanes.
    tm = max(_SUBLANE, _TARGET_TILE_BYTES // (cols * itemsize))
    tm = (tm // _SUBLANE) * _SUBLANE
    tm = min(tm, rows)  # tm == rows (full extent) is exempt from the 8-row rule
    grid = (pl.cdiv(rows, tm),)
    return pl.pallas_call(
        _copy_kernel,
        out_shape=jax.ShapeDtypeStruct(flat.shape, flat.dtype),
        grid=grid,
        in_specs=[pl.BlockSpec((tm, cols), lambda i: (i, 0))],
        out_specs=pl.BlockSpec((tm, cols), lambda i: (i, 0)),
        compiler_params=pltpu.CompilerParams(
            dimension_semantics=("parallel",)),
    )(flat)


def identity(x, *, materialize=True):
    """Identity forward: returns x unchanged.

    materialize=False returns x directly (the optimal, zero-cost identity).
    materialize=True runs a bandwidth-optimal Pallas copy kernel (used here so
    the kernel path is actually exercised on TPU).
    """
    if not materialize:
        return x

    orig_shape = x.shape
    n = x.size
    if n == 0:
        return x

    cols = _best_lane_width(n)
    if cols is None:
        # Tiny / awkward element count: single full-extent block
        # (full-extent blocks are exempt from the (8,128) divisibility rule).
        flat = x.reshape(1, n)
        out = pl.pallas_call(
            _copy_kernel,
            out_shape=jax.ShapeDtypeStruct(flat.shape, flat.dtype),
            in_specs=[pl.BlockSpec(flat.shape, lambda: (0, 0))],
            out_specs=pl.BlockSpec(flat.shape, lambda: (0, 0)),
        )(flat)
    else:
        flat = x.reshape(n // cols, cols)
        out = _lane_dense_copy(flat)
    return out.reshape(orig_shape)


if __name__ == "__main__":
    key = jax.random.PRNGKey(0)
    k1, k2 = jax.random.split(key)

    # Shape from the reference module: x = torch.randn(1, 1, 2, 3)
    x = jax.random.normal(k1, (1, 1, 2, 3), dtype=jnp.float32)
    y = identity(x)
    jax.block_until_ready(y)
    assert y.shape == x.shape and y.dtype == x.dtype
    assert bool(jnp.all(y == x))

    # Larger NCHW input exercising the lane-dense tiled copy path.
    x2 = jax.random.normal(k2, (2, 4, 16, 16), dtype=jnp.float32)
    y2 = identity(x2)
    jax.block_until_ready(y2)
    assert y2.shape == x2.shape and y2.dtype == x2.dtype
    assert bool(jnp.all(y2 == x2))

    print("KERNEL_OK")
</pallas_src>

<mosaic_0001>
module attributes {stable_mosaic.version = 11 : i64} {
  func.func @_copy_kernel(%arg0: memref<1x6xf32, #tpu.memory_space<vmem>>, %arg1: memref<1x6xf32, #tpu.memory_space<vmem>>) attributes {dimension_semantics = [], scalar_prefetch = 0 : i64, scratch_operands = 0 : i64, tpu.core_type = #tpu.core_type<tc>} {
    %c0 = arith.constant 0 : index
    %c0_0 = arith.constant 0 : index
    %0 = vector.load %arg0[%c0, %c0_0] : memref<1x6xf32, #tpu.memory_space<vmem>>, vector<1x6xf32>
    %c0_1 = arith.constant 0 : index
    %c0_2 = arith.constant 0 : index
    %1 = vector.load %arg1[%c0_1, %c0_2] : memref<1x6xf32, #tpu.memory_space<vmem>>, vector<1x6xf32>
    tpu.vector_store %arg1[%c0_1, %c0_2], %0 {strides = array<i32>} : memref<1x6xf32, #tpu.memory_space<vmem>>, vector<1x6xf32>,
    return
  }
}

</mosaic_0001>

<bundles_post_ra>
// kernel: tpu_custom_call.1
= control target key start
LH: loop header
LB: loop body
LE: loop exit
PB: predicated region body
PF: predicated region fallthrough
CT: control target
= control target key end

     0   :  { %6 = vsyncpa [#allocation3], 0  ;;  %s125_s0 = inlined_call_operand.hbm [shape: f32[1,6], index: 0, kind: input, shape index: {}]   ;;  %s126_s1 = inlined_call_operand.hbm [shape: f32[1,6], index: 1, kind: output, shape index: {}]  }
   0x1   :  { %7 = vsyncpa [#allocation4], 0  ;;  %s89_s6 = smov [#allocation2]   ;;  %s41_s10 = scalar_lea.hbm %s125_s0, 16 }
   0x2   :  { %s14_s7 = sshll.u32 %s89_s6, 4  ;;  %p42_p0 = scmp.ne.s32.totalorder %s125_s0, %s41_s10  ;;  %s15_s7 = int_to_ptr.vmem [resolvable:$true] %s14_s7 }
   0x3   :  { %p45_p1 = scmp.lt.u32.totalorder %s41_s10, %s125_s0 }
   0x5   :  { %p47_p2 = pnand %p45_p1, %p42_p0 }
   0x7   :  { %50 = shalt.err (!%p47_p2)
}
   0x8   :  { %s51_s15 = scalar_lea.vmem %s15_s7, 16  ;;  %s55_s16 = scalar_lea.vmem %s15_s7, 32 }
   0x9   :  { %p52_p3 = scmp.ne.s32.totalorder %s15_s7, %s51_s15  ;;  %p56_p4 = scmp.lt.s32.totalorder %s15_s7, %s15_s7 }
   0xa   :  { %p57_p5 = scmp.lt.s32.totalorder %s55_s16, %s51_s15 }
   0xc   :  { %p58_p6 = por %p57_p5, %p56_p4 }
   0xe   :  { %p59_p7 = pnand %p58_p6, %p52_p3 }
  0x10   :  { %62 = shalt.err (!%p59_p7)
}
  0x11   :  { %17 = dma.hbm_to_vmem [thread:$0]  %s125_s0, 16, %s15_s7, [#allocation3]  }
  0x12   :  { %85 = dma.done.wait [#allocation3], 16  }
  0x13   :  { %86 = vsyncadd [#allocation3], 4294967280  ;;  %s90_s19 = smov [#allocation5]   ;;  %vm22_vm0 = vcmask 40960   ;;  %v21_v0 = vld [vmem:[#allocation2] sm:$0x1] }
  0x14   :  { %s30_s20 = sshll.u32 %s90_s19, 4  ;;  %23 = vst.msk [vmem:[#allocation5] sm:$0x1] %vm22_vm0, %v21_v0  ;;  %s31_s20 = int_to_ptr.vmem [resolvable:$true] %s30_s20 }
  0x15   :  { %s63_s21 = scalar_lea.vmem %s31_s20, 16  ;;  %s67_s22 = scalar_lea.vmem %s31_s20, 32 }
  0x16   :  { %p64_p8 = scmp.ne.s32.totalorder %s31_s20, %s63_s21  ;;  %p68_p9 = scmp.lt.s32.totalorder %s31_s20, %s31_s20 }
  0x17   :  { %p69_p10 = scmp.lt.s32.totalorder %s67_s22, %s63_s21 }
  0x19   :  { %p70_p11 = por %p69_p10, %p68_p9 }
  0x1b   :  { %p71_p12 = pnand %p70_p11, %p64_p8 }
  0x1d   :  { %74 = shalt.err (!%p71_p12)
}
  0x1e   :  { %s75_s0 = scalar_lea.hbm %s126_s1, 16 }
  0x1f   :  { %p76_p13 = scmp.ne.s32.totalorder %s126_s1, %s75_s0  ;;  %p79_p0 = scmp.lt.u32.totalorder %s75_s0, %s126_s1 }
  0x21   :  { %p81_p1 = pnand %p79_p0, %p76_p13 }
  0x23   :  { %84 = shalt.err (!%p81_p1)
}
  0x24   :  { %33 = dma.vmem_to_hbm [thread:$0]  %s31_s20, 16, %s126_s1, [#allocation4]  }
  0x25   :  { %87 = dma.done.wait [#allocation4], 16  }
  0x26   :  { %88 = vsyncadd [#allocation4], 4294967280 }
  0x27   :  { %37 = vsyncpa [#allocation3], 1 }
  0x28   :  { %38 = vsyncpa [#allocation4], 1 }

</bundles_post_ra>
